<compile_context>
chip_gen: v7x
topology: tpu7x:2x2x1
jax: 0.10.0
libtpu: 0.0.40
codegen_flags: <defaults>
</compile_context>

<pallas_src>
import functools

import jax
import jax.numpy as jnp
from jax.experimental import pallas as pl
from jax.experimental.pallas import tpu as pltpu

LANE = 128
_VMEM_BUDGET_BYTES = 40 << 20   # conservative: fits v7x's 64 MiB physical VMEM
_MAX_TB = 512                   # worst-case batch tile used for footprint checks


def _round_up(x, m):
    return (x + m - 1) // m * m


def _vmem_footprint_bytes(tb, tk, u_pad, n_k, out_bytes=4):
    """Approximate VMEM usage of one pallas_call instance."""
    u3 = 3 * u_pad
    w = (1 if n_k == 1 else 2) * tk * u3 * 2   # bf16 fused W (single-buffered when resident)
    b = u3 * 4                                 # f32 fused bias (Buffered(1))
    x = 2 * tb * tk * 4                        # f32 x tile, double buffered
    h = 2 * tb * u_pad * 4                     # f32 pre_h tile
    o = 2 * tb * u_pad * out_bytes             # out tile
    acc = tb * u3 * 4 if n_k > 1 else 0        # f32 accumulator (K-tiled path only)
    return w + b + x + h + o + acc


def _choose_batch_tile(batch):
    b16 = _round_up(batch, 16)     # multiple of 16: full bf16 sublane packing of the MXU LHS
    if b16 < 256:
        return b16                 # one tile; splitting would only add padding waste
    if b16 < 1024:
        return 128                 # >= 2 tiles -> both v7x TensorCores get work
    return 512                     # large B: ~85% of HBM roofline per measured tile sweep


def prepare_minlstm_params(wf, bf, wi, bi, wh, bh, *, force_block_k=None,
                           vmem_budget_bytes=_VMEM_BUDGET_BYTES):
    """One-time weight prep: pad, fuse the three gate linears, cast to bf16.

    wf/wi/wh: (D, U) f32; bf/bi/bh: (1, U) or (U,) f32.
    Do NOT call this per timestep -- reuse the returned dict across steps.
    """
    d, u = wf.shape
    u_pad = _round_up(u, LANE)
    d_pad = _round_up(d, LANE)

    # Pick the K (input-feature) tile: fully resident W if it fits the VMEM
    # budget (single-buffered thanks to Buffered(1)), else stream K chunks.
    if force_block_k is not None:
        tk = int(force_block_k)
    elif _vmem_footprint_bytes(_MAX_TB, d_pad, u_pad, n_k=1) <= vmem_budget_bytes:
        tk = d_pad
    else:
        tk = d_pad
        while tk > LANE and _vmem_footprint_bytes(_MAX_TB, tk, u_pad, n_k=2) > vmem_budget_bytes:
            tk -= LANE
        # TODO(synk): extremely large U would additionally need tiling of the
        # 3*U output dimension (and N-tiled accumulation); not implemented.
    d_pad = _round_up(d_pad, tk)

    def pad_w(w):
        return jnp.pad(w, ((0, d_pad - d), (0, u_pad - u)))

    def pad_b(b):
        b = jnp.asarray(b).reshape(1, -1)
        return jnp.pad(b, ((0, 0), (0, u_pad - u)))

    # Zero-padded gate columns are harmless: they never produce NaN/Inf in the
    # epilogue and are sliced away from the output.
    w_cat = jnp.concatenate([pad_w(wf), pad_w(wi), pad_w(wh)], axis=1)
    b_cat = jnp.concatenate([pad_b(bf), pad_b(bi), pad_b(bh)], axis=1)
    return dict(
        w_cat=w_cat.astype(jnp.bfloat16),   # (D_pad, 3*U_pad) bf16
        b_cat=b_cat.astype(jnp.float32),    # (1, 3*U_pad) f32
        units=int(u),
        input_size=int(d),
        block_k=int(tk),
    )


def minlstm_kernel(pre_h_ref, x_ref, w_ref, b_ref, out_ref, *scratch,
                   u_pad, n_k, approx_recip):
    # Fused-gate matmul on the MXU; x is cast f32 -> bf16 in-kernel (VPU cast
    # hides under the matmul and avoids an extra wrapper-side HBM pass).
    part = jnp.dot(x_ref[...].astype(jnp.bfloat16), w_ref[...],
                   preferred_element_type=jnp.float32)

    def epilogue(z):
        zf = z[:, :u_pad]
        zi = z[:, u_pad:2 * u_pad]
        tilde_h = z[:, 2 * u_pad:3 * u_pad]
        # f' = sigmoid(zf) / (sigmoid(zf) + sigmoid(zi))
        #    = (1 + e^{-zi}) / (2 + e^{-zf} + e^{-zi})
        # -> 2 exps + 1 reciprocal on the EUP instead of 2 sigmoids + 1 recip.
        ef = jnp.exp(-jnp.maximum(zf, -60.0))   # clamp: avoid inf/inf for huge |z|
        ei = jnp.exp(-jnp.maximum(zi, -60.0))
        den = 2.0 + ef + ei
        if approx_recip:
            f_prime = (1.0 + ei) * pl.reciprocal(den, approx=True)
        else:
            f_prime = (1.0 + ei) / den
        # i' = 1 - f'  =>  h = tilde_h + f' * (pre_h - tilde_h)
        h_t = tilde_h + f_prime * (pre_h_ref[...] - tilde_h)
        out_ref[...] = h_t.astype(out_ref.dtype)

    if n_k == 1:
        # Resident-W fast path: no accumulator round-trip.
        epilogue(part + b_ref[...])
    else:
        acc_ref = scratch[0]
        k = pl.program_id(1)

        @pl.when(k == 0)
        def _():
            acc_ref[...] = jnp.zeros_like(acc_ref)

        acc_ref[...] += part

        @pl.when(k == n_k - 1)
        def _():
            epilogue(acc_ref[...] + b_ref[...])


def min_lstm_cell(pre_h, x_t, params, *, approx_recip=True):
    """pre_h: (B, U) f32, x_t: (B, D) f32 -> (B, U) f32.

    `params` comes from prepare_minlstm_params (weights already fused / padded
    / bf16-cast once, outside the per-step call).
    """
    units, d = params["units"], params["input_size"]
    w_cat, b_cat = params["w_cat"], params["b_cat"]
    tk = params["block_k"]
    d_pad, u3 = w_cat.shape
    u_pad = u3 // 3
    n_k = d_pad // tk

    batch = pre_h.shape[0]
    tb = _choose_batch_tile(batch)
    b_pad = _round_up(batch, tb)
    n_b = b_pad // tb

    x_t = x_t.astype(jnp.float32)
    pre_h = pre_h.astype(jnp.float32)
    if x_t.shape != (b_pad, d_pad):
        x_t = jnp.pad(x_t, ((0, b_pad - batch), (0, d_pad - d)))
    if pre_h.shape != (b_pad, u_pad):
        pre_h = jnp.pad(pre_h, ((0, b_pad - batch), (0, u_pad - units)))

    # Explicit scoped-VMEM limit (default is 16/32 MiB on v5e / v6e+), with
    # headroom, capped well under v7x's 64 MiB physical VMEM.
    vmem_needed = _vmem_footprint_bytes(tb, tk, u_pad, n_k)
    vmem_limit = min(max(vmem_needed + (vmem_needed >> 2) + (4 << 20), 32 << 20), 56 << 20)

    kernel = functools.partial(minlstm_kernel, u_pad=u_pad, n_k=n_k,
                               approx_recip=approx_recip)

    out = pl.pallas_call(
        kernel,
        out_shape=jax.ShapeDtypeStruct((b_pad, u_pad), jnp.float32),
        grid=(n_b, n_k),
        in_specs=[
            pl.BlockSpec((tb, u_pad), lambda i, k: (i, 0)),            # pre_h tile
            pl.BlockSpec((tb, tk), lambda i, k: (i, k)),               # x tile (f32)
            pl.BlockSpec((tk, u3), lambda i, k: (k, 0),                # fused W
                         pipeline_mode=pl.Buffered(1) if n_k == 1 else None),
            pl.BlockSpec((1, u3), lambda i, k: (0, 0),                 # fused bias
                         pipeline_mode=pl.Buffered(1)),
        ],
        out_specs=pl.BlockSpec((tb, u_pad), lambda i, k: (i, 0)),
        scratch_shapes=([pltpu.VMEM((tb, u3), jnp.float32)] if n_k > 1 else []),
        compiler_params=pltpu.CompilerParams(
            dimension_semantics=("parallel", "arbitrary"),
            vmem_limit_bytes=int(vmem_limit)),
    )(pre_h, x_t, w_cat, b_cat)

    return out[:batch, :units]


def init_linear_params(key, in_features, out_features):
    # Mimic torch.nn.Linear default init: U(-1/sqrt(in), 1/sqrt(in)).
    kw, kb = jax.random.split(key)
    bound = 1.0 / jnp.sqrt(jnp.float32(in_features))
    # Stored as (in_features, out_features): transpose of torch's (out, in).
    w = jax.random.uniform(kw, (in_features, out_features), jnp.float32, -bound, bound)
    b = jax.random.uniform(kb, (1, out_features), jnp.float32, -bound, bound)
    return w, b


def reference_min_lstm(pre_h, x_t, wf, bf, wi, bi, wh, bh):
    # Matches kernel matmul precision: bf16 x/W operands, f32 accumulation,
    # f32 bias (intentional precision change vs. the f32 PyTorch nn.Linear).
    xb = x_t.astype(jnp.bfloat16).astype(jnp.float32)

    def lin(w, b):
        wb = w.astype(jnp.bfloat16).astype(jnp.float32)
        return xb @ wb + b.reshape(1, -1)

    f_t = jax.nn.sigmoid(lin(wf, bf))
    i_t = jax.nn.sigmoid(lin(wi, bi))
    tilde_h = lin(wh, bh)
    s = f_t + i_t
    return (f_t / s) * pre_h + (i_t / s) * tilde_h


if __name__ == "__main__":
    key = jax.random.PRNGKey(0)

    def run_case(batch, input_size, units, ks, force_block_k=None):
        k_pre, k_x, k_f, k_i, k_h = jax.random.split(ks, 5)
        pre_h = jax.random.normal(k_pre, (batch, units), jnp.float32)
        x_t = jax.random.normal(k_x, (batch, input_size), jnp.float32)
        wf, bf = init_linear_params(k_f, input_size, units)
        wi, bi = init_linear_params(k_i, input_size, units)
        wh, bh = init_linear_params(k_h, input_size, units)

        # Weight prep is done once, outside the per-step call.
        params = prepare_minlstm_params(wf, bf, wi, bi, wh, bh,
                                        force_block_k=force_block_k)
        h_t = jax.block_until_ready(min_lstm_cell(pre_h, x_t, params))
        h_ref = reference_min_lstm(pre_h, x_t, wf, bf, wi, bi, wh, bh)
        assert h_t.shape == (batch, units)
        assert jnp.allclose(h_t, h_ref, atol=5e-3, rtol=5e-3), (
            f"mismatch vs reference (batch={batch}, D={input_size}, U={units})")

    k1, k2 = jax.random.split(key)
    # Resident-W fast path (the module's default small demo shape).
    run_case(batch=8, input_size=32, units=32, ks=k1)
    # K-tiled path (forced block_k=128 -> 2 K steps) to exercise the VMEM
    # accumulator / "arbitrary" reduction axis that large D/U would take.
    run_case(batch=8, input_size=256, units=32, ks=k2, force_block_k=128)

    print("KERNEL_OK")
</pallas_src>

<mosaic_0001>
module attributes {stable_mosaic.version = 11 : i64} {
  func.func @minlstm_kernel(%arg0: i32, %arg1: i32, %arg2: memref<16x128xf32, #tpu.memory_space<vmem>>, %arg3: memref<16x128xf32, #tpu.memory_space<vmem>>, %arg4: memref<128x384xbf16, #tpu.memory_space<vmem>>, %arg5: memref<1x384xf32, #tpu.memory_space<vmem>>, %arg6: memref<16x128xf32, #tpu.memory_space<vmem>>) attributes {dimension_semantics = [#tpu.dimension_semantics<parallel>, #tpu.dimension_semantics<arbitrary>], iteration_bounds = array<i64: 1, 1>, scalar_prefetch = 0 : i64, scratch_operands = 0 : i64, tpu.core_type = #tpu.core_type<tc>, window_params = [{transform_indices = @transform_0, window_bounds = array<i64: 16, 128>}, {transform_indices = @transform_1, window_bounds = array<i64: 16, 128>}, {pipeline_mode = #tpu.pipeline_mode<synchronous>, transform_indices = @transform_2, window_bounds = array<i64: 128, 384>}, {pipeline_mode = #tpu.pipeline_mode<synchronous>, transform_indices = @transform_3, window_bounds = array<i64: 1, 384>}, {transform_indices = @transform_4, window_bounds = array<i64: 16, 128>}]} {
    %c0 = arith.constant 0 : index
    %c0_0 = arith.constant 0 : index
    %0 = vector.load %arg3[%c0, %c0_0] : memref<16x128xf32, #tpu.memory_space<vmem>>, vector<16x128xf32>
    %1 = arith.truncf %0 : vector<16x128xf32> to vector<16x128xbf16>
    %c0_1 = arith.constant 0 : index
    %c0_2 = arith.constant 0 : index
    %2 = vector.load %arg4[%c0_1, %c0_2] : memref<128x384xbf16, #tpu.memory_space<vmem>>, vector<128x384xbf16>
    %cst = arith.constant dense<0.000000e+00> : vector<16x384xf32>
    %3 = tpu.matmul %1, %2, %cst {dimension_numbers = #tpu.dot_dimension_numbers<[1], [0], [0], [1], [0, 0, 1, 1], [], []>} : vector<16x128xbf16>, vector<128x384xbf16>, vector<16x384xf32> -> vector<16x384xf32>
    %c0_3 = arith.constant 0 : index
    %c0_4 = arith.constant 0 : index
    %4 = vector.load %arg5[%c0_3, %c0_4] : memref<1x384xf32, #tpu.memory_space<vmem>>, vector<1x384xf32>
    %5 = vector.broadcast %4 : vector<1x384xf32> to vector<16x384xf32>
    %6 = arith.addf %3, %5 : vector<16x384xf32>
    %7 = vector.extract_strided_slice %6 {offsets = [0, 0], sizes = [16, 128], strides = [1, 1]} : vector<16x384xf32> to vector<16x128xf32>
    %8 = vector.extract_strided_slice %6 {offsets = [0, 128], sizes = [16, 128], strides = [1, 1]} : vector<16x384xf32> to vector<16x128xf32>
    %9 = vector.extract_strided_slice %6 {offsets = [0, 256], sizes = [16, 128], strides = [1, 1]} : vector<16x384xf32> to vector<16x128xf32>
    %cst_5 = arith.constant -6.000000e+01 : f32
    %10 = vector.broadcast %cst_5 : f32 to vector<16x128xf32>
    %11 = arith.maximumf %7, %10 : vector<16x128xf32>
    %cst_6 = arith.constant 0.000000e+00 : f32
    %12 = vector.broadcast %cst_6 : f32 to vector<16x128xf32>
    %13 = arith.subf %12, %11 : vector<16x128xf32>
    %14 = math.exp %13 : vector<16x128xf32>
    %cst_7 = arith.constant -6.000000e+01 : f32
    %15 = vector.broadcast %cst_7 : f32 to vector<16x128xf32>
    %16 = arith.maximumf %8, %15 : vector<16x128xf32>
    %cst_8 = arith.constant 0.000000e+00 : f32
    %17 = vector.broadcast %cst_8 : f32 to vector<16x128xf32>
    %18 = arith.subf %17, %16 : vector<16x128xf32>
    %19 = math.exp %18 : vector<16x128xf32>
    %cst_9 = arith.constant 2.000000e+00 : f32
    %20 = vector.broadcast %cst_9 : f32 to vector<16x128xf32>
    %21 = arith.addf %20, %14 : vector<16x128xf32>
    %22 = arith.addf %21, %19 : vector<16x128xf32>
    %cst_10 = arith.constant 1.000000e+00 : f32
    %23 = vector.broadcast %cst_10 : f32 to vector<16x128xf32>
    %24 = arith.addf %23, %19 : vector<16x128xf32>
    %25 = tpu.reciprocal %22 {approx = true} : vector<16x128xf32> -> vector<16x128xf32>
    %26 = arith.mulf %24, %25 : vector<16x128xf32>
    %c0_11 = arith.constant 0 : index
    %c0_12 = arith.constant 0 : index
    %27 = vector.load %arg2[%c0_11, %c0_12] : memref<16x128xf32, #tpu.memory_space<vmem>>, vector<16x128xf32>
    %28 = arith.subf %27, %9 : vector<16x128xf32>
    %29 = arith.mulf %26, %28 : vector<16x128xf32>
    %30 = arith.addf %9, %29 : vector<16x128xf32>
    %c0_13 = arith.constant 0 : index
    %c0_14 = arith.constant 0 : index
    %31 = vector.load %arg6[%c0_13, %c0_14] : memref<16x128xf32, #tpu.memory_space<vmem>>, vector<16x128xf32>
    tpu.vector_store %arg6[%c0_13, %c0_14], %30 {strides = array<i32>} : memref<16x128xf32, #tpu.memory_space<vmem>>, vector<16x128xf32>,
    return
  }
  func.func @transform_0(%arg0: i32, %arg1: i32) -> (i32, i32) {
    %c0_i32 = arith.constant 0 : i32
    %c0_i32_0 = arith.constant 0 : i32
    return %arg0, %c0_i32 : i32, i32
  }
  func.func @transform_1(%arg0: i32, %arg1: i32) -> (i32, i32) {
    %c0_i32 = arith.constant 0 : i32
    return %arg0, %arg1 : i32, i32
  }
  func.func @transform_2(%arg0: i32, %arg1: i32) -> (i32, i32) {
    %c0_i32 = arith.constant 0 : i32
    %c0_i32_0 = arith.constant 0 : i32
    return %arg1, %c0_i32 : i32, i32
  }
  func.func @transform_3(%arg0: i32, %arg1: i32) -> (i32, i32) {
    %c0_i32 = arith.constant 0 : i32
    %c0_i32_0 = arith.constant 0 : i32
    %c0_i32_1 = arith.constant 0 : i32
    return %c0_i32, %c0_i32_0 : i32, i32
  }
  func.func @transform_4(%arg0: i32, %arg1: i32) -> (i32, i32) {
    %c0_i32 = arith.constant 0 : i32
    %c0_i32_0 = arith.constant 0 : i32
    return %arg0, %c0_i32 : i32, i32
  }
}

</mosaic_0001>

<bundles_post_ra>
// kernel: tpu_custom_call.1
= control target key start
LH: loop header
LB: loop body
LE: loop exit
PB: predicated region body
PF: predicated region fallthrough
CT: control target
= control target key end

     0   :  { %9 = vsyncpa [#allocation3], 0  ;;  %s683_s0 = inlined_call_operand.hbm [shape: f32[16,128], index: 0, kind: input, shape index: {}]   ;;  %s684_s1 = inlined_call_operand.hbm [shape: f32[16,128], index: 1, kind: input, shape index: {}]   ;;  %s685_s2 = inlined_call_operand.hbm [shape: bf16[128,384], index: 2, kind: input, shape index: {}]   ;;  %s686_s3 = inlined_call_operand.vmem [shape: f32[1,384], index: 3, kind: input, shape index: {}]   ;;  %s687_s4 = inlined_call_operand.hbm [shape: f32[16,128], index: 4, kind: output, shape index: {}]  }
   0x1   :  { %10 = vsyncpa [#allocation6], 0 }
   0x2   :  { %11 = vsyncpa [#allocation4], 0  ;;  %s580_s15 = smov [#allocation5]   ;;  %s581_s17 = smov [#allocation2]  }
   0x3   :  { %s29_s16 = sshll.u32 %s580_s15, 4  ;;  %s17_s18 = sshll.u32 %s581_s17, 4  ;;  %s30_s16 = int_to_ptr.vmem [resolvable:$true] %s29_s16  ;;  %s616_s18 = int_to_ptr.vmem [resolvable:$true] %s17_s18 }
   0x4   :  { %s486_s21 = scalar_lea.hbm %s684_s1, 256 }
   0x5   :  { %p487_p0 = scmp.ne.s32.totalorder %s684_s1, %s486_s21  ;;  %p490_p1 = scmp.lt.u32.totalorder %s486_s21, %s684_s1 }
   0x7   :  { %p492_p2 = pnand %p490_p1, %p487_p0 }
   0x9   :  { %495 = shalt.err (!%p492_p2)
}
   0xa   :  { %s496_s26 = scalar_lea.vmem %s30_s16, 256  ;;  %p501_p4 = scmp.lt.s32.totalorder %s30_s16, %s30_s16 }
   0xb   :  { %p497_p3 = scmp.ne.s32.totalorder %s30_s16, %s496_s26  ;;  %p502_p5 = scmp.lt.s32.totalorder %s496_s26, %s496_s26 }
   0xd   :  { %p503_p6 = por %p502_p5, %p501_p4 }
   0xf   :  { %p504_p7 = pnand %p503_p6, %p497_p3 }
  0x11   :  { %507 = shalt.err (!%p504_p7)
}
  0x12   :  { %s582_s27 = smov 128   ;;  %s583_s28 = smov 8  }
  0x13   :  { %35 = dma.hbm_to_vmem [thread:$0]  %s684_s1, 256, %s30_s16, [#allocation6], %s582_s27, %s582_s27, %s583_s28  }
  0x14   :  { %s508_s7 = scalar_lea.hbm %s683_s0, 256 }
  0x15   :  { %p509_p8 = scmp.ne.s32.totalorder %s683_s0, %s508_s7  ;;  %p512_p9 = scmp.lt.u32.totalorder %s508_s7, %s683_s0 }
  0x17   :  { %p514_p10 = pnand %p512_p9, %p509_p8 }
  0x19   :  { %517 = shalt.err (!%p514_p10)
}
  0x1a   :  { %s518_s12 = scalar_lea.vmem %s616_s18, 256  ;;  %p523_p12 = scmp.lt.s32.totalorder %s616_s18, %s616_s18 }
  0x1b   :  { %p519_p11 = scmp.ne.s32.totalorder %s616_s18, %s518_s12  ;;  %p524_p13 = scmp.lt.s32.totalorder %s518_s12, %s518_s12 }
  0x1d   :  { %p525_p0 = por %p524_p13, %p523_p12 }
  0x1f   :  { %p526_p1 = pnand %p525_p0, %p519_p11 }
  0x21   :  { %529 = shalt.err (!%p526_p1)
}
  0x22   :  { %23 = dma.hbm_to_vmem [thread:$0]  %s683_s0, 256, %s616_s18, [#allocation3], %s582_s27, %s582_s27, %s583_s28  }
  0x23   :  { %s584_s14 = smov [#allocation7]   ;;  %s530_s19 = scalar_lea.hbm %s685_s2, 3072 }
  0x24   :  { %s41_s15 = sshll.u32 %s584_s14, 4  ;;  %p531_p2 = scmp.ne.s32.totalorder %s685_s2, %s530_s19  ;;  %s42_s15 = int_to_ptr.vmem [resolvable:$true] %s41_s15 }
  0x25   :  { %p534_p3 = scmp.lt.u32.totalorder %s530_s19, %s685_s2 }
  0x27   :  { %p536_p4 = pnand %p534_p3, %p531_p2 }
  0x29   :  { %539 = shalt.err (!%p536_p4)
}
  0x2a   :  { %s540_s24 = scalar_lea.vmem %s42_s15, 3072  ;;  %p545_p6 = scmp.lt.s32.totalorder %s42_s15, %s42_s15 }
  0x2b   :  { %p541_p5 = scmp.ne.s32.totalorder %s42_s15, %s540_s24  ;;  %p546_p7 = scmp.lt.s32.totalorder %s540_s24, %s540_s24 }
  0x2d   :  { %p547_p8 = por %p546_p7, %p545_p6 }
  0x2f   :  { %p548_p9 = pnand %p547_p8, %p541_p5 }
  0x31   :  { %551 = shalt.err (!%p548_p9)
}
  0x32   :  { %s585_s0 = smov 192   ;;  %s586_s18 = smov 12  }
  0x33   :  { %47 = dma.hbm_to_vmem [thread:$0]  %s685_s2, 3072, %s42_s15, [#allocation6], %s585_s0, %s585_s0, %s586_s18  }
  0x34   :  { %574 = dma.done.wait [#allocation3], 256  }
  0x35   :  { %575 = vsyncadd [#allocation3], 4294967040 }
  0x36   :  { %576 = dma.done.wait [#allocation6], 3328  }
  0x37   :  { %577 = vsyncadd [#allocation6], 4294963968  ;;  %v587_v0 = vmov 0.0   ;;  %v588_v1 = vmov 0   ;;  %vm589_vm0 = vmmov 0   ;;  %v60_v23 = vld [vmem:[#allocation5] sm:$0xff]  ;;  %v97_v29 = vlaneseq }
  0x38   :  { %411 = vmatprep.subr.bf16.mxu1 %v587_v0  ;;  %272 = vmatprep.mubr.bf16.mxu0 %v588_v1  ;;  %v442_v2 = vld [vmem:[#allocation7 + $0x4] ss:$12 sps:$4 sm:$0xff]   ;;  %v444_v3 = vld [vmem:[#allocation7] ss:$12 sps:$4 sm:$0xff]   ;;  %v445_v4 = vld [vmem:[#allocation7 + $0x1c] ss:$12 sps:$4 sm:$0xff]  }
  0x39   :  { %427 = vmatprep.mubr.msk.bf16.mxu1 %vm589_vm0, %v587_v0  ;;  %240 = vmatprep.subr.bf16.mxu0 %v442_v2  ;;  %v447_v5 = vld [vmem:[#allocation7 + $0x18] ss:$12 sps:$4 sm:$0xff]   ;;  %v448_v6 = vld [vmem:[#allocation7 + $0x34] ss:$12 sps:$4 sm:$0xff]   ;;  %v450_v7 = vld [vmem:[#allocation7 + $0x30] ss:$12 sps:$4 sm:$0xff]  }
  0x3a   :  { %241 = vmatpush1.bf16.msra.mxu0 %v444_v3  ;;  %v451_v8 = vld [vmem:[#allocation7 + $0x4c] ss:$12 sps:$4 sm:$0xff]   ;;  %v453_v9 = vld [vmem:[#allocation7 + $0x48] ss:$12 sps:$4 sm:$0xff]   ;;  %v454_v11 = vld [vmem:[#allocation7 + $0x64] ss:$12 sps:$4 sm:$0xff]  }
  0x3b   :  { %242 = vmatprep.subr.bf16.mxu0 %v445_v4  ;;  %v466_v10 = vld [vmem:[#allocation7 + $0x8] ss:$12 sps:$4 sm:$0xff]   ;;  %v467_v12 = vld [vmem:[#allocation7 + $0x20] ss:$12 sps:$4 sm:$0xff]   ;;  %v468_v15 = vld [vmem:[#allocation7 + $0x38] ss:$12 sps:$4 sm:$0xff]  }
  0x3c   :  { %412 = vmatpush3.bf16.msra.mxu1 %v466_v10  ;;  %v456_v13 = vld [vmem:[#allocation7 + $0x60] ss:$12 sps:$4 sm:$0xff]   ;;  %v457_v14 = vld [vmem:[#allocation7 + $0x7c] ss:$12 sps:$4 sm:$0xff]   ;;  %v459_v16 = vld [vmem:[#allocation7 + $0x78] ss:$12 sps:$4 sm:$0xff]  }
  0x3d   :  { %413 = vmatprep.subr.bf16.mxu1 %v587_v0  ;;  %v460_v17 = vld [vmem:[#allocation7 + $0x94] ss:$12 sps:$4 sm:$0xff]   ;;  %v469_v18 = vld [vmem:[#allocation7 + $0x50] ss:$12 sps:$4 sm:$0xff]   ;;  %v463_v20 = vld [vmem:[#allocation7 + $0xac] ss:$12 sps:$4 sm:$0xff]  }
  0x3e   :  { %243 = vmatpush1.bf16.msra.mxu0 %v447_v5  ;;  %v462_v19 = vld [vmem:[#allocation7 + $0x90] ss:$12 sps:$4 sm:$0xff]   ;;  %v470_v21 = vld [vmem:[#allocation7 + $0x68] ss:$12 sps:$4 sm:$0xff]   ;;  %v471_v25 = vld [vmem:[#allocation7 + $0x80] ss:$12 sps:$4 sm:$0xff]  }
  0x3f   :  { %244 = vmatprep.subr.bf16.mxu0 %v448_v6  ;;  %v465_v22 = vld [vmem:[#allocation7 + $0xa8] ss:$12 sps:$4 sm:$0xff]   ;;  %v61_v24 = vld [vmem:[#allocation5 + $0x8] sm:$0xff]  ;;  %v98_v30 = vshrl.u32 %v97_v29, 7  ;;  %v95_v32 = vld [vmem:[%s686_s3] sm:$0x7] }
  0x40   :  { %414 = vmatpush3.bf16.msra.mxu1 %v467_v12  ;;  %v62_v26 = vpack.c.bf16 %v61_v24, %v60_v23  ;;  %v472_v27 = vld [vmem:[#allocation7 + $0x98] ss:$12 sps:$4 sm:$0xff]   ;;  %v473_v28 = vld [vmem:[#allocation7 + $0xb0] ss:$12 sps:$4 sm:$0xff]   ;;  %v351_v12 = vld [vmem:[#allocation2 + $0x8] sm:$0xff]  ;;  %s590_s3 = smov [#allocation8]  }
  0x41   :  { %415 = vmatprep.subr.bf16.mxu1 %v587_v0  ;;  %v99_v31 = vsub.s32 0, %v98_v30  ;;  %v103_v33 = vsub.s32 1, %v98_v30  ;;  %s365_s30 = sshll.u32 %s590_s3, 4  ;;  %s366_s30 = int_to_ptr.vmem [resolvable:$true] %s365_s30 }
  0x42   :  { %245 = vmatpush1.bf16.msra.mxu0 %v450_v7  ;;  %v350_v7 = vld [vmem:[#allocation2] sm:$0xff]  ;;  %s552_s5 = scalar_lea.vmem %s366_s30, 256  ;;  %p557_p11 = scmp.lt.s32.totalorder %s366_s30, %s366_s30 }
  0x43   :  { %246 = vmatprep.subr.bf16.mxu0 %v451_v8  ;;  %v100_v34 = vrot.slane %v95_v32, %v99_v31  ;;  %v104_v35 = vrot.slane %v95_v32, %v103_v33  ;;  %p553_p10 = scmp.ne.s32.totalorder %s366_s30, %s552_s5  ;;  %p558_p12 = scmp.lt.s32.totalorder %s552_s5, %s552_s5 }
  0x44   :  { %416 = vmatpush3.bf16.msra.mxu1 %v468_v15 }
  0x45   :  { %417 = vmatprep.subr.bf16.mxu1 %v587_v0  ;;  %p559_p13 = por %p558_p12, %p557_p11 }
  0x46   :  { %247 = vmatpush1.bf16.msra.mxu0 %v453_v9 }
  0x47   :  { %248 = vmatprep.subr.bf16.mxu0 %v454_v11  ;;  %p560_p0 = pnand %p559_p13, %p553_p10 }
  0x48   :  { %418 = vmatpush3.bf16.msra.mxu1 %v469_v18 }
  0x49   :  { %419 = vmatprep.subr.bf16.mxu1 %v587_v0 }
  0x4a   :  { %249 = vmatpush1.bf16.msra.mxu0 %v456_v13 }
  0x4b   :  { %250 = vmatprep.subr.bf16.mxu0 %v457_v14 }
  0x4c   :  { %420 = vmatpush3.bf16.msra.mxu1 %v470_v21 }
  0x4d   :  { %421 = vmatprep.subr.bf16.mxu1 %v587_v0 }
  0x4e   :  { %251 = vmatpush1.bf16.msra.mxu0 %v459_v16 }
  0x4f   :  { %252 = vmatprep.subr.bf16.mxu0 %v460_v17 }
  0x50   :  { %422 = vmatpush3.bf16.msra.mxu1 %v471_v25 }
  0x51   :  { %423 = vmatprep.subr.bf16.mxu1 %v587_v0 }
  0x52   :  { %253 = vmatpush1.bf16.msra.mxu0 %v462_v19 }
  0x53   :  { %254 = vmatprep.subr.bf16.mxu0 %v463_v20 }
  0x54   :  { %424 = vmatpush3.bf16.msra.mxu1 %v472_v27 }
  0x55   :  { %425 = vmatprep.subr.bf16.mxu1 %v587_v0  ;;  %v107_v0 = vsub.s32 2, %v98_v30 }
  0x56   :  { %255 = vmatpush1.bf16.msra.mxu0 %v465_v22 }
  0x57   :  { %v108_v5 = vrot.slane %v95_v32, %v107_v0 }
  0x58   :  { %426 = vmatpush3.bf16.msra.mxu1 %v473_v28 }
  0x59   :  { %273 = vmatmul.mubr.bf16.vlgmr.msra.gmra.mrb[0].mxu0 %v62_v26 }
  0x5b   :  { %428 = vmatmul.mubr.bf16.vlgmr.msra.gmra.mrb[0].mxu1 %v62_v26 }
 0x12c   :  { %v274_v36 = vpop.f32.mrb[0].mxu0 }
 0x12d   :  { %v275_v37 = vadd.f32 %v274_v36, %v100_v34  ;;  %v276_v38 = vpop.f32.mrb[1].mxu0 }
 0x12e   :  { %v277_v39 = vadd.f32 %v276_v38, %v104_v35  ;;  %v278_v40 = vpop.f32.mrb[2].mxu0  ;;  %v317_v56 = vpop.f32.mrb[0].mxu1 }
 0x12f   :  { %v324_v41 = vmax.f32 %v275_v37, -60.0  ;;  %v279_v42 = vadd.f32 %v278_v40, %v100_v34  ;;  %v280_v43 = vpop.f32.mrb[3].mxu0  ;;  %v429_v57 = vpop.f32.mrb[1].mxu1  ;;  %v318_v6 = vadd.f32 %v317_v56, %v108_v5 }
 0x130   :  { %v332_v44 = vmax.f32 %v277_v39, -60.0  ;;  %v281_v45 = vadd.f32 %v280_v43, %v104_v35  ;;  %v320_v58 = vpop.f32.mrb[2].mxu1 }
 0x131   :  { %v326_v46 = vsub.f32 0.0, %v324_v41  ;;  %v325_v47 = vmax.f32 %v279_v42, -60.0  ;;  %v430_v59 = vpop.f32.mrb[3].mxu1  ;;  %v352_v9 = vsub.f32 %v350_v7, %v318_v6  ;;  %v321_v10 = vadd.f32 %v320_v58, %v108_v5 }
 0x132   :  { %v334_v48 = vsub.f32 0.0, %v332_v44  ;;  %v333_v49 = vmax.f32 %v281_v45, -60.0 }
 0x133   :  { %v328_v50 = vmul.f32 1.442695, %v326_v46  ;;  %v327_v51 = vsub.f32 0.0, %v325_v47  ;;  %v353_v18 = vsub.f32 %v351_v12, %v321_v10 }
 0x134   :  { %v336_v52 = vmul.f32 1.442695, %v334_v48  ;;  %v335_v53 = vsub.f32 0.0, %v333_v49 }
 0x135   :  { %474 = vpow2.f32 %v328_v50  ;;  %v330_v54 = vmul.f32 1.442695, %v327_v51 }
 0x136   :  { %476 = vpow2.f32 %v336_v52  ;;  %v338_v55 = vmul.f32 1.442695, %v335_v53 }
 0x137   :  { %478 = vpow2.f32 %v330_v54 }
 0x138   :  { %480 = vpow2.f32 %v338_v55 }
 0x13f   :  { %v475_v60 = vpop.eup %474 }
 0x140   :  { %v477_v61 = vpop.eup %476  ;;  %v340_v62 = vadd.f32 2.0, %v475_v60 }
 0x141   :  { %v479_v63 = vpop.eup %478  ;;  %v344_v8 = vadd.f32 1.0, %v477_v61 }
 0x142   :  { %v481_v1 = vpop.eup %480  ;;  %v342_v2 = vadd.f32 %v477_v61, %v340_v62  ;;  %v341_v3 = vadd.f32 2.0, %v479_v63 }
 0x143   :  { %v345_v14 = vadd.f32 1.0, %v481_v1 }
 0x144   :  { %482 = vrcp.f32 %v342_v2  ;;  %v343_v4 = vadd.f32 %v481_v1, %v341_v3 }
 0x146   :  { %484 = vrcp.f32 %v343_v4 }
 0x14e   :  { %v483_v11 = vpop.eup %482 }
 0x14f   :  { %v348_v13 = vmul.f32 %v483_v11, %v344_v8 }
 0x150   :  { %v485_v15 = vpop.eup %484 }
 0x151   :  { %v354_v16 = vmul.f32 %v352_v9, %v348_v13  ;;  %v349_v17 = vmul.f32 %v485_v15, %v345_v14 }
 0x153   :  { %v356_v19 = vadd.f32 %v354_v16, %v318_v6  ;;  %v355_v20 = vmul.f32 %v353_v18, %v349_v17 }
 0x155   :  { %358 = vst [vmem:[#allocation8] sm:$0xff] %v356_v19  ;;  %v357_v21 = vadd.f32 %v355_v20, %v321_v10 }
 0x157   :  { %359 = vst [vmem:[#allocation8 + $0x8] sm:$0xff] %v357_v21 }
 0x158   :  { %563 = shalt.err (!%p560_p0)
}
 0x159   :  { %s564_s8 = scalar_lea.hbm %s687_s4, 256 }
 0x15a   :  { %p565_p1 = scmp.ne.s32.totalorder %s687_s4, %s564_s8  ;;  %p568_p2 = scmp.lt.u32.totalorder %s564_s8, %s687_s4 }
 0x15c   :  { %p570_p3 = pnand %p568_p2, %p565_p1 }
 0x15e   :  { %573 = shalt.err (!%p570_p3)
}
 0x15f   :  { %371 = dma.vmem_to_hbm [thread:$0]  %s366_s30, 256, %s687_s4, [#allocation4], %s582_s27, %s582_s27, %s583_s28  }
 0x160   :  { %578 = dma.done.wait [#allocation4], 256  }
 0x161   :  { %579 = vsyncadd [#allocation4], 4294967040 }
 0x162   :  { %375 = vsyncpa [#allocation3], 1 }
 0x163   :  { %376 = vsyncpa [#allocation6], 1 }
 0x164   :  { %377 = vsyncpa [#allocation4], 1 }

</bundles_post_ra>
